<compile_context>
chip_gen: v7x
topology: tpu7x:2x2x1
jax: 0.10.0
libtpu: 0.0.40
codegen_flags: <defaults>
</compile_context>

<pallas_src>
import functools

import jax
import jax.numpy as jnp
from jax.experimental import pallas as pl
from jax.experimental.pallas import tpu as pltpu


def _mlp_kernel(*refs, num_layers):
    """Fused MLP in transposed (feature-major) layout.

    refs = (x_ref, w0, b0, w1, b1, ..., w_{L-1}, b_{L-1}, out_ref)

    x_ref  : [dim_in,  n_tile]   (N on the 128-lane axis)
    w_l    : [dout_l,  din_l]    (PyTorch nn.Linear layout)
    b_l    : [dout_l,  1]
    out_ref: [dim_out, n_tile]
    """
    x_ref = refs[0]
    out_ref = refs[-1]
    param_refs = refs[1:-1]

    h = x_ref[...].astype(jnp.float32)                           # [din, n_tile]
    for layer in range(num_layers):
        w = param_refs[2 * layer][...].astype(jnp.float32)       # [dout, din]
        b = param_refs[2 * layer + 1][...].astype(jnp.float32)   # [dout, 1]
        din = w.shape[1]
        if din < 8:
            # Tiny contraction (first layer, dim_in=2): a couple of broadcast
            # FMAs on the VPU beat an MXU pass with K padded to 128/256, and
            # skip an MXU round trip entirely.
            h_new = w[:, 0:1] * h[0:1, :]
            for k in range(1, din):
                h_new = h_new + w[:, k:k + 1] * h[k:k + 1, :]
            h = h_new + b
        else:
            h = jnp.dot(w, h, preferred_element_type=jnp.float32) + b
        if layer < num_layers - 1:
            h = jnp.maximum(h, 0.0)   # ReLU on hidden layers; Identity on final
    out_ref[...] = h.astype(out_ref.dtype)
    # TODO(synk): optionally cast hidden weights/activations to bf16 for the
    # MXU on v6e/v7x (keep f32 accumulation); kept f32 here for exact parity
    # with the PyTorch module.


def mlp_pallas(x, weights, biases, *, n_tile=1024):
    """Run the fused MLP kernel.

    x:       [N, dim_in]  float32
    weights: list of [dout_l, din_l]  (torch nn.Linear layout)
    biases:  list of [dout_l, 1]
    returns: [N, dim_out]
    """
    n, dim_in = x.shape
    num_layers = len(weights)
    dim_out = weights[-1].shape[0]

    # Lane axis must be a multiple of 128 (or the full extent).  Use an
    # adaptive column tile so small N doesn't pay for a full 1024-wide tile,
    # then pad N up to a multiple of that tile.
    n_128 = ((n + 127) // 128) * 128
    n_tile_eff = min(n_tile, n_128)
    n_pad = ((n + n_tile_eff - 1) // n_tile_eff) * n_tile_eff

    x_t = x.T                                   # [dim_in, N], N on lane axis
    if n_pad != n:
        x_t = jnp.pad(x_t, ((0, 0), (0, n_pad - n)))

    grid = (n_pad // n_tile_eff,)

    # x / out are tiled over columns (points); every parameter is a single
    # full-array block, resident in VMEM across all grid steps (constant
    # index_map -> no re-DMA).
    in_specs = [pl.BlockSpec((dim_in, n_tile_eff), lambda i: (0, i))]
    for w, b in zip(weights, biases):
        in_specs.append(pl.BlockSpec(w.shape, lambda i: (0, 0)))
        in_specs.append(pl.BlockSpec(b.shape, lambda i: (0, 0)))
    out_spec = pl.BlockSpec((dim_out, n_tile_eff), lambda i: (0, i))

    kernel = functools.partial(_mlp_kernel, num_layers=num_layers)

    flat_params = []
    for w, b in zip(weights, biases):
        flat_params += [w, b]

    out_t = pl.pallas_call(
        kernel,
        out_shape=jax.ShapeDtypeStruct((dim_out, n_pad), x.dtype),
        grid_spec=pltpu.PrefetchScalarGridSpec(
            num_scalar_prefetch=0,
            grid=grid,
            in_specs=in_specs,
            out_specs=out_spec,
        ),
        compiler_params=pltpu.CompilerParams(
            # Embarrassingly parallel over points -> shards across the two
            # TensorCores on v7x; no-op on v5e/v6e.
            dimension_semantics=("parallel",),
        ),
    )(x_t, *flat_params)

    return out_t[:, :n].T                       # back to [N, dim_out]


def mlp_reference(x, weights, biases):
    """Pure-JAX reference mirroring the PyTorch module."""
    h = x.astype(jnp.float32)
    num_layers = len(weights)
    for layer in range(num_layers):
        h = h @ weights[layer].T.astype(jnp.float32) \
            + biases[layer][:, 0].astype(jnp.float32)
        if layer < num_layers - 1:
            h = jnp.maximum(h, 0.0)
    return h.astype(x.dtype)


def init_mlp_params(key, dim_in, num_layers, dim_hidden, dim_out):
    """Deterministic parameter init (Kaiming-uniform-ish like torch.nn.Linear).

    Weights in torch layout [dout, din]; biases as [dout, 1].
    """
    weights, biases = [], []
    dims_in = [dim_in] + [dim_hidden] * (num_layers - 1)
    dims_out = [dim_hidden] * (num_layers - 1) + [dim_out]
    for din, dout in zip(dims_in, dims_out):
        key, kw, kb = jax.random.split(key, 3)
        bound = 1.0 / jnp.sqrt(jnp.float32(din))
        w = jax.random.uniform(kw, (dout, din), jnp.float32, -bound, bound)
        b = jax.random.uniform(kb, (dout, 1), jnp.float32, -bound, bound)
        weights.append(w)
        biases.append(b)
    return weights, biases


if __name__ == "__main__":
    # Small config consistent with the module: coordinate MLP
    #   dim_in=2, num_layers=4, dim_hidden=32, group_size=1, patch_size=None
    #   -> dim_out = 3 * group_size = 3
    dim_in = 2
    num_layers = 4
    dim_hidden = 32
    dim_out = 3            # patch_size=None, group_size=1
    n_points = 1000        # not a multiple of the tile -> exercises padding

    key = jax.random.PRNGKey(0)
    key, kx = jax.random.split(key)
    x = jax.random.normal(kx, (n_points, dim_in), jnp.float32)

    weights, biases = init_mlp_params(key, dim_in, num_layers, dim_hidden, dim_out)

    out = mlp_pallas(x, weights, biases, n_tile=1024)
    out = jax.block_until_ready(out)

    ref = mlp_reference(x, weights, biases)
    assert out.shape == (n_points, dim_out), out.shape
    max_err = jnp.max(jnp.abs(out - ref))
    assert jnp.allclose(out, ref, atol=3e-5, rtol=3e-5), f"max abs err {max_err}"

    # TODO(synk): if patch_size were set, the final out.view(group_size, N, 3, p, p)
    # reshape would be plain-JAX glue outside the kernel; omitted (patch_size=None).
    print("KERNEL_OK")
</pallas_src>

<mosaic_0001>
module attributes {stable_mosaic.version = 11 : i64} {
  func.func @_mlp_kernel(%arg0: i32, %arg1: memref<2x1024xf32, #tpu.memory_space<vmem>>, %arg2: memref<32x2xf32, #tpu.memory_space<vmem>>, %arg3: memref<32x1xf32, #tpu.memory_space<vmem>>, %arg4: memref<32x32xf32, #tpu.memory_space<vmem>>, %arg5: memref<32x1xf32, #tpu.memory_space<vmem>>, %arg6: memref<32x32xf32, #tpu.memory_space<vmem>>, %arg7: memref<32x1xf32, #tpu.memory_space<vmem>>, %arg8: memref<3x32xf32, #tpu.memory_space<vmem>>, %arg9: memref<3x1xf32, #tpu.memory_space<vmem>>, %arg10: memref<3x1024xf32, #tpu.memory_space<vmem>>) attributes {dimension_semantics = [#tpu.dimension_semantics<parallel>], iteration_bounds = array<i64: 1>, scalar_prefetch = 0 : i64, scratch_operands = 0 : i64, tpu.core_type = #tpu.core_type<tc>, window_params = [{transform_indices = @transform_0, window_bounds = array<i64: 2, 1024>}, {pipeline_mode = #tpu.pipeline_mode<synchronous>, transform_indices = @transform_1, window_bounds = array<i64: 32, 2>}, {pipeline_mode = #tpu.pipeline_mode<synchronous>, transform_indices = @transform_2, window_bounds = array<i64: 32, 1>}, {pipeline_mode = #tpu.pipeline_mode<synchronous>, transform_indices = @transform_3, window_bounds = array<i64: 32, 32>}, {pipeline_mode = #tpu.pipeline_mode<synchronous>, transform_indices = @transform_4, window_bounds = array<i64: 32, 1>}, {pipeline_mode = #tpu.pipeline_mode<synchronous>, transform_indices = @transform_5, window_bounds = array<i64: 32, 32>}, {pipeline_mode = #tpu.pipeline_mode<synchronous>, transform_indices = @transform_6, window_bounds = array<i64: 32, 1>}, {pipeline_mode = #tpu.pipeline_mode<synchronous>, transform_indices = @transform_7, window_bounds = array<i64: 3, 32>}, {pipeline_mode = #tpu.pipeline_mode<synchronous>, transform_indices = @transform_8, window_bounds = array<i64: 3, 1>}, {transform_indices = @transform_9, window_bounds = array<i64: 3, 1024>}]} {
    %c0 = arith.constant 0 : index
    %c0_0 = arith.constant 0 : index
    %0 = vector.load %arg1[%c0, %c0_0] : memref<2x1024xf32, #tpu.memory_space<vmem>>, vector<2x1024xf32>
    %c0_1 = arith.constant 0 : index
    %c0_2 = arith.constant 0 : index
    %1 = vector.load %arg2[%c0_1, %c0_2] : memref<32x2xf32, #tpu.memory_space<vmem>>, vector<32x2xf32>
    %c0_3 = arith.constant 0 : index
    %c0_4 = arith.constant 0 : index
    %2 = vector.load %arg3[%c0_3, %c0_4] : memref<32x1xf32, #tpu.memory_space<vmem>>, vector<32x1xf32>
    %3 = vector.extract_strided_slice %1 {offsets = [0, 0], sizes = [32, 1], strides = [1, 1]} : vector<32x2xf32> to vector<32x1xf32>
    %4 = vector.extract_strided_slice %0 {offsets = [0, 0], sizes = [1, 1024], strides = [1, 1]} : vector<2x1024xf32> to vector<1x1024xf32>
    %5 = vector.broadcast %3 : vector<32x1xf32> to vector<32x1024xf32>
    %6 = vector.broadcast %4 : vector<1x1024xf32> to vector<32x1024xf32>
    %7 = arith.mulf %5, %6 : vector<32x1024xf32>
    %8 = vector.extract_strided_slice %1 {offsets = [0, 1], sizes = [32, 1], strides = [1, 1]} : vector<32x2xf32> to vector<32x1xf32>
    %9 = vector.extract_strided_slice %0 {offsets = [1, 0], sizes = [1, 1024], strides = [1, 1]} : vector<2x1024xf32> to vector<1x1024xf32>
    %10 = vector.broadcast %8 : vector<32x1xf32> to vector<32x1024xf32>
    %11 = vector.broadcast %9 : vector<1x1024xf32> to vector<32x1024xf32>
    %12 = arith.mulf %10, %11 : vector<32x1024xf32>
    %13 = arith.addf %7, %12 : vector<32x1024xf32>
    %14 = vector.broadcast %2 : vector<32x1xf32> to vector<32x1024xf32>
    %15 = arith.addf %13, %14 : vector<32x1024xf32>
    %cst = arith.constant 0.000000e+00 : f32
    %16 = vector.broadcast %cst : f32 to vector<32x1024xf32>
    %17 = arith.maximumf %15, %16 : vector<32x1024xf32>
    %c0_5 = arith.constant 0 : index
    %c0_6 = arith.constant 0 : index
    %18 = vector.load %arg4[%c0_5, %c0_6] : memref<32x32xf32, #tpu.memory_space<vmem>>, vector<32x32xf32>
    %c0_7 = arith.constant 0 : index
    %c0_8 = arith.constant 0 : index
    %19 = vector.load %arg5[%c0_7, %c0_8] : memref<32x1xf32, #tpu.memory_space<vmem>>, vector<32x1xf32>
    %cst_9 = arith.constant dense<0.000000e+00> : vector<32x1024xf32>
    %20 = tpu.matmul %18, %17, %cst_9 {dimension_numbers = #tpu.dot_dimension_numbers<[1], [0], [0], [1], [0, 0, 1, 1], [], []>} : vector<32x32xf32>, vector<32x1024xf32>, vector<32x1024xf32> -> vector<32x1024xf32>
    %21 = vector.broadcast %19 : vector<32x1xf32> to vector<32x1024xf32>
    %22 = arith.addf %20, %21 : vector<32x1024xf32>
    %cst_10 = arith.constant 0.000000e+00 : f32
    %23 = vector.broadcast %cst_10 : f32 to vector<32x1024xf32>
    %24 = arith.maximumf %22, %23 : vector<32x1024xf32>
    %c0_11 = arith.constant 0 : index
    %c0_12 = arith.constant 0 : index
    %25 = vector.load %arg6[%c0_11, %c0_12] : memref<32x32xf32, #tpu.memory_space<vmem>>, vector<32x32xf32>
    %c0_13 = arith.constant 0 : index
    %c0_14 = arith.constant 0 : index
    %26 = vector.load %arg7[%c0_13, %c0_14] : memref<32x1xf32, #tpu.memory_space<vmem>>, vector<32x1xf32>
    %cst_15 = arith.constant dense<0.000000e+00> : vector<32x1024xf32>
    %27 = tpu.matmul %25, %24, %cst_15 {dimension_numbers = #tpu.dot_dimension_numbers<[1], [0], [0], [1], [0, 0, 1, 1], [], []>} : vector<32x32xf32>, vector<32x1024xf32>, vector<32x1024xf32> -> vector<32x1024xf32>
    %28 = vector.broadcast %26 : vector<32x1xf32> to vector<32x1024xf32>
    %29 = arith.addf %27, %28 : vector<32x1024xf32>
    %cst_16 = arith.constant 0.000000e+00 : f32
    %30 = vector.broadcast %cst_16 : f32 to vector<32x1024xf32>
    %31 = arith.maximumf %29, %30 : vector<32x1024xf32>
    %c0_17 = arith.constant 0 : index
    %c0_18 = arith.constant 0 : index
    %32 = vector.load %arg8[%c0_17, %c0_18] : memref<3x32xf32, #tpu.memory_space<vmem>>, vector<3x32xf32>
    %c0_19 = arith.constant 0 : index
    %c0_20 = arith.constant 0 : index
    %33 = vector.load %arg9[%c0_19, %c0_20] : memref<3x1xf32, #tpu.memory_space<vmem>>, vector<3x1xf32>
    %cst_21 = arith.constant dense<0.000000e+00> : vector<3x1024xf32>
    %34 = tpu.matmul %32, %31, %cst_21 {dimension_numbers = #tpu.dot_dimension_numbers<[1], [0], [0], [1], [0, 0, 1, 1], [], []>} : vector<3x32xf32>, vector<32x1024xf32>, vector<3x1024xf32> -> vector<3x1024xf32>
    %35 = vector.broadcast %33 : vector<3x1xf32> to vector<3x1024xf32>
    %36 = arith.addf %34, %35 : vector<3x1024xf32>
    %c0_22 = arith.constant 0 : index
    %c0_23 = arith.constant 0 : index
    %37 = vector.load %arg10[%c0_22, %c0_23] : memref<3x1024xf32, #tpu.memory_space<vmem>>, vector<3x1024xf32>
    tpu.vector_store %arg10[%c0_22, %c0_23], %36 {strides = array<i32>} : memref<3x1024xf32, #tpu.memory_space<vmem>>, vector<3x1024xf32>,
    return
  }
  func.func @transform_0(%arg0: i32) -> (i32, i32) {
    %c0_i32 = arith.constant 0 : i32
    %c0_i32_0 = arith.constant 0 : i32
    return %c0_i32, %arg0 : i32, i32
  }
  func.func @transform_1(%arg0: i32) -> (i32, i32) {
    %c0_i32 = arith.constant 0 : i32
    %c0_i32_0 = arith.constant 0 : i32
    %c0_i32_1 = arith.constant 0 : i32
    return %c0_i32, %c0_i32_0 : i32, i32
  }
  func.func @transform_2(%arg0: i32) -> (i32, i32) {
    %c0_i32 = arith.constant 0 : i32
    %c0_i32_0 = arith.constant 0 : i32
    %c0_i32_1 = arith.constant 0 : i32
    return %c0_i32, %c0_i32_0 : i32, i32
  }
  func.func @transform_3(%arg0: i32) -> (i32, i32) {
    %c0_i32 = arith.constant 0 : i32
    %c0_i32_0 = arith.constant 0 : i32
    %c0_i32_1 = arith.constant 0 : i32
    return %c0_i32, %c0_i32_0 : i32, i32
  }
  func.func @transform_4(%arg0: i32) -> (i32, i32) {
    %c0_i32 = arith.constant 0 : i32
    %c0_i32_0 = arith.constant 0 : i32
    %c0_i32_1 = arith.constant 0 : i32
    return %c0_i32, %c0_i32_0 : i32, i32
  }
  func.func @transform_5(%arg0: i32) -> (i32, i32) {
    %c0_i32 = arith.constant 0 : i32
    %c0_i32_0 = arith.constant 0 : i32
    %c0_i32_1 = arith.constant 0 : i32
    return %c0_i32, %c0_i32_0 : i32, i32
  }
  func.func @transform_6(%arg0: i32) -> (i32, i32) {
    %c0_i32 = arith.constant 0 : i32
    %c0_i32_0 = arith.constant 0 : i32
    %c0_i32_1 = arith.constant 0 : i32
    return %c0_i32, %c0_i32_0 : i32, i32
  }
  func.func @transform_7(%arg0: i32) -> (i32, i32) {
    %c0_i32 = arith.constant 0 : i32
    %c0_i32_0 = arith.constant 0 : i32
    %c0_i32_1 = arith.constant 0 : i32
    return %c0_i32, %c0_i32_0 : i32, i32
  }
  func.func @transform_8(%arg0: i32) -> (i32, i32) {
    %c0_i32 = arith.constant 0 : i32
    %c0_i32_0 = arith.constant 0 : i32
    %c0_i32_1 = arith.constant 0 : i32
    return %c0_i32, %c0_i32_0 : i32, i32
  }
  func.func @transform_9(%arg0: i32) -> (i32, i32) {
    %c0_i32 = arith.constant 0 : i32
    %c0_i32_0 = arith.constant 0 : i32
    return %c0_i32, %arg0 : i32, i32
  }
}

</mosaic_0001>

<bundles_post_ra>
// kernel: tpu_custom_call.1
= control target key start
LH: loop header
LB: loop body
LE: loop exit
PB: predicated region body
PF: predicated region fallthrough
CT: control target
= control target key end

     0   :  { %v1756_v2 = vmov 1   ;;  %v1757_v4 = vmov 0   ;;  %s2284_s0 = inlined_call_operand.vmem [shape: f32[2,1024], index: 0, kind: input, shape index: {}]   ;;  %s2285_s1 = inlined_call_operand.vmem [shape: f32[32,2], index: 1, kind: input, shape index: {}]   ;;  %s2286_s2 = inlined_call_operand.vmem [shape: f32[32,1], index: 2, kind: input, shape index: {}]   ;;  %s2287_s3 = inlined_call_operand.vmem [shape: f32[32,32], index: 3, kind: input, shape index: {}]   ;;  %s2288_s4 = inlined_call_operand.vmem [shape: f32[32,1], index: 4, kind: input, shape index: {}]   ;;  %s2289_s5 = inlined_call_operand.vmem [shape: f32[32,32], index: 5, kind: input, shape index: {}]   ;;  %s2290_s6 = inlined_call_operand.vmem [shape: f32[32,1], index: 6, kind: input, shape index: {}]   ;;  %s2291_s7 = inlined_call_operand.vmem [shape: f32[3,32], index: 7, kind: input, shape index: {}]   ;;  %s2292_s8 = inlined_call_operand.vmem [shape: f32[3,1], index: 8, kind: input, shape index: {}]   ;;  %s2293_s9 = inlined_call_operand.hbm [shape: f32[3,1024], index: 9, kind: output, shape index: {}]  }
   0x1   :  { %v37_v0 = vld [vmem:[%s2285_s1 + $0x10] sm:$0xff]  ;;  %v35_v1 = vld [vmem:[%s2285_s1] sm:$0xff]  ;;  %1728 = vset.pattern.permute.xlu0 %v1756_v2  ;;  %1726 = vset.pattern.permute.xlu1 %v1756_v2  ;;  %v36_v3 = vld [vmem:[%s2285_s1 + $0x8] sm:$0xff] }
   0x2   :  { %178 = vperm.xlu0 %1728, %v37_v0   ;;  %170 = vperm.xlu1 %1726, %v35_v1  }
   0x6   :  { %1729 = vset.pattern.permute.xlu0 %v1757_v4  ;;  %174 = vperm.xlu1 %1726, %v36_v3  }
   0x7   :  { %14 = vsyncpa [#allocation3], 0  ;;  %45 = vperm.xlu0 %1729, %v35_v1   ;;  %v38_v5 = vld [vmem:[%s2285_s1 + $0x18] sm:$0xff]  ;;  %v40_v6 = vld [vmem:[%s2286_s2 + $0x8] sm:$0xff]  ;;  %v2294_v18 = vmov 0.0   ;;  %v65_v20 = vlaneseq  ;;  %vm433_vm0 = vcmask 261120  }
   0x8   :  { %v39_v7 = vld [vmem:[%s2286_s2] sm:$0xff]  ;;  %v41_v9 = vld [vmem:[%s2286_s2 + $0x10] sm:$0xff]  ;;  %v42_v11 = vld [vmem:[%s2286_s2 + $0x18] sm:$0xff]  ;;  %510 = vmatprep.mubr.f32.mxu0 %v2294_v18  ;;  %599 = vmatprep.mubr.f32.mxu1 %v2294_v18 }
   0x9   :  { %v409_v8 = vld [vmem:[%s2288_s4] sm:$0xff]  ;;  %v411_v10 = vld [vmem:[%s2288_s4 + $0x10] sm:$0xff]  ;;  %v410_v13 = vld [vmem:[%s2288_s4 + $0x8] sm:$0xff]  ;;  %v66_v21 = vshrl.u32 %v65_v20, 7 }
   0xa   :  { %1727 = vset.pattern.permute.xlu1 %v1757_v4  ;;  %v838_v12 = vld [vmem:[%s2290_s6] sm:$0xff]  ;;  %v840_v14 = vld [vmem:[%s2290_s6 + $0x10] sm:$0xff]  ;;  %v412_v15 = vld [vmem:[%s2288_s4 + $0x18] sm:$0xff] }
   0xb   :  { %50 = vperm.xlu0 %1729, %v36_v3   ;;  %60 = vperm.xlu1 %1727, %v38_v5   ;;  %v1263_v16 = vld [vmem:[%s2292_s8] sm:$0x7]  ;;  %v839_v17 = vld [vmem:[%s2290_s6 + $0x8] sm:$0xff]  ;;  %v841_v19 = vld [vmem:[%s2290_s6 + $0x18] sm:$0xff]  ;;  %v187_v22 = vsub.s32 1, %v66_v21  ;;  %v191_v23 = vsub.s32 3, %v66_v21 }
   0xc   :  { %v199_v24 = vsub.s32 7, %v66_v21  ;;  %v195_v25 = vsub.s32 5, %v66_v21  ;;  %v33_v26 = vld [vmem:[%s2284_s0] sm:$0xff]  ;;  %v67_v27 = vsub.s32 0, %v66_v21  ;;  %v71_v28 = vsub.s32 2, %v66_v21  ;;  %v34_v31 = vld [vmem:[%s2284_s0 + $0x8] sm:$0xff] }
   0xd   :  { %v79_v29 = vsub.s32 6, %v66_v21  ;;  %v75_v30 = vsub.s32 4, %v66_v21  ;;  %v192_v32 = vrot.slane %v33_v26, %v191_v23  ;;  %v188_v34 = vrot.slane %v33_v26, %v187_v22 }
   0xe   :  { %v200_v33 = vrot.slane %v33_v26, %v199_v24  ;;  %v196_v35 = vrot.slane %v33_v26, %v195_v25  ;;  %v72_v36 = vrot.slane %v33_v26, %v71_v28  ;;  %v68_v38 = vrot.slane %v33_v26, %v67_v27 }
   0xf   :  { %55 = vperm.xlu0 %1729, %v37_v0   ;;  %1730 = vset.pattern.permute.xlu1 %v1756_v2  ;;  %v80_v37 = vrot.slane %v33_v26, %v79_v29  ;;  %v76_v39 = vrot.slane %v33_v26, %v75_v30  ;;  %v212_v40 = vrot.slane %v34_v31, %v195_v25 }
  0x10   :  { %182 = vperm.xlu1 %1730, %v38_v5   ;;  %v208_v41 = vrot.slane %v34_v31, %v191_v23  ;;  %v216_v42 = vrot.slane %v34_v31, %v199_v24  ;;  %v204_v43 = vrot.slane %v34_v31, %v187_v22  ;;  %v92_v44 = vrot.slane %v34_v31, %v75_v30 }
  0x11   :  { %v88_v45 = vrot.slane %v34_v31, %v71_v28  ;;  %v96_v46 = vrot.slane %v34_v31, %v79_v29  ;;  %v84_v47 = vrot.slane %v34_v31, %v67_v27  ;;  %v1869_v48 = vrot.slane %v192_v32, %v187_v22 }
  0x12   :  { %v1871_v49 = vrot.slane %v200_v33, %v187_v22  ;;  %v1873_v50 = vrot.slane %v188_v34, %v187_v22  ;;  %v1875_v51 = vrot.slane %v196_v35, %v187_v22  ;;  %v1877_v52 = vrot.slane %v72_v36, %v67_v27 }
  0x13   :  { %328 = vperm.xlu0 %1729, %v40_v6   ;;  %v1879_v53 = vrot.slane %v80_v37, %v67_v27  ;;  %v1881_v54 = vrot.slane %v68_v38, %v67_v27  ;;  %v1883_v55 = vrot.slane %v76_v39, %v67_v27  ;;  %v1885_v56 = vrot.slane %v208_v41, %v187_v22 }
  0x14   :  { %1731 = vset.pattern.permute.xlu1 %v1757_v4  ;;  %v1887_v57 = vrot.slane %v216_v42, %v187_v22  ;;  %v1889_v58 = vrot.slane %v204_v43, %v187_v22  ;;  %v1891_v59 = vrot.slane %v212_v40, %v187_v22  ;;  %v1893_v62 = vrot.slane %v88_v45, %v67_v27 }
  0x15   :  { %323 = vperm.xlu1 %1731, %v39_v7   ;;  %v1895_v63 = vrot.slane %v96_v46, %v67_v27  ;;  %v1897_v0 = vrot.slane %v84_v47, %v67_v27  ;;  %v1899_v1 = vrot.slane %v92_v44, %v67_v27 }
  0x16   :  { %2297 = vst [vmem:[#allocation5_spill] sm:$0xff] %v1889_v58 }
  0x17   :  { %415 = vperm.xlu0 %1729, %v409_v8  }
  0x19   :  { %333 = vperm.xlu1 %1731, %v41_v9  }
  0x1b   :  { %425 = vperm.xlu0 %1729, %v411_v10  }
  0x1d   :  { %338 = vperm.xlu1 %1731, %v42_v11  }
  0x1f   :  { %844 = vperm.xlu0 %1729, %v838_v12  }
  0x21   :  { %420 = vperm.xlu1 %1731, %v410_v13  }
  0x23   :  { %854 = vperm.xlu0 %1729, %v840_v14  }
  0x25   :  { %430 = vperm.xlu1 %1731, %v412_v15  }
  0x27   :  { %1266 = vperm.xlu0 %1729, %v1263_v16  }
  0x29   :  { %849 = vperm.xlu1 %1731, %v839_v17  }
  0x2d   :  { %859 = vperm.xlu1 %1731, %v841_v19  }
  0x81   :  { %v171_v60 = vpop.permute.xlu1 %170  ;;  %v179_v61 = vpop.permute.xlu0 %178 }
  0x82   :  { %v258_v2 = vmul.f32 %v1869_v48, %v171_v60  ;;  %v260_v3 = vmul.f32 %v1871_v49, %v171_v60  ;;  %v257_v4 = vmul.f32 %v1873_v50, %v171_v60  ;;  %v259_v5 = vmul.f32 %v1875_v51, %v171_v60 }
  0x83   :  { %v274_v6 = vmul.f32 %v1869_v48, %v179_v61  ;;  %v276_v7 = vmul.f32 %v1871_v49, %v179_v61  ;;  %v273_v8 = vmul.f32 %v1873_v50, %v179_v61  ;;  %v275_v9 = vmul.f32 %v1875_v51, %v179_v61 }
  0x84   :  { %v262_v10 = vmul.f32 %v1885_v56, %v171_v60  ;;  %v264_v11 = vmul.f32 %v1887_v57, %v171_v60  ;;  %v261_v12 = vmul.f32 %v1889_v58, %v171_v60  ;;  %v1913_v13 = vmul.f32 %v1891_v59, %v171_v60 }
  0x85   :  { %v1915_v14 = vpop.permute.xlu1 %174  ;;  %v1918_v15 = vmul.f32 %v1885_v56, %v179_v61  ;;  %v1921_v16 = vmul.f32 %v1887_v57, %v179_v61  ;;  %v1924_v17 = vmul.f32 %v1889_v58, %v179_v61  ;;  %v1927_v19 = vmul.f32 %v1891_v59, %v179_v61 }
  0x86   :  { %v1929_v20 = vpop.permute.xlu0 %45  ;;  %v266_v21 = vmul.f32 %v1869_v48, %v1915_v14  ;;  %v268_v22 = vmul.f32 %v1871_v49, %v1915_v14  ;;  %v265_v23 = vmul.f32 %v1873_v50, %v1915_v14  ;;  %v267_v24 = vmul.f32 %v1875_v51, %v1915_v14 }
  0x87   :  { %2298 = vst [vmem:[#allocation6_spill] sm:$0xff] %v1924_v17  ;;  %2299 = vst [vmem:[#allocation7_spill] sm:$0xff] %v1927_v19  ;;  %v138_v25 = vmul.f32 %v1877_v52, %v1929_v20  ;;  %v140_v26 = vmul.f32 %v1879_v53, %v1929_v20  ;;  %v137_v27 = vmul.f32 %v1881_v54, %v1929_v20 }
  0x88   :  { %v139_v28 = vmul.f32 %v1883_v55, %v1929_v20  ;;  %v142_v29 = vmul.f32 %v1893_v62, %v1929_v20  ;;  %v270_v30 = vmul.f32 %v1885_v56, %v1915_v14  ;;  %v144_v31 = vmul.f32 %v1895_v63, %v1929_v20 }
  0x89   :  { %v272_v32 = vmul.f32 %v1887_v57, %v1915_v14  ;;  %v290_v33 = vadd.f32 %v258_v2, %v138_v25  ;;  %v292_v34 = vadd.f32 %v260_v3, %v140_v26  ;;  %v289_v35 = vadd.f32 %v257_v4, %v137_v27 }
  0x8a   :  { %v291_v36 = vadd.f32 %v259_v5, %v139_v28  ;;  %v1955_v37 = vpop.permute.xlu0 %50  ;;  %v1957_v38 = vpop.permute.xlu1 %60  ;;  %v294_v39 = vadd.f32 %v262_v10, %v142_v29  ;;  %v296_v40 = vadd.f32 %v264_v11, %v144_v31  ;;  %v141_v41 = vmul.f32 %v1897_v0, %v1929_v20 }
  0x8b   :  { %v269_v42 = vmul.f32 %v1889_v58, %v1915_v14  ;;  %v146_v43 = vmul.f32 %v1877_v52, %v1955_v37  ;;  %v148_v44 = vmul.f32 %v1879_v53, %v1955_v37  ;;  %v145_v45 = vmul.f32 %v1881_v54, %v1955_v37 }
  0x8c   :  { %v147_v46 = vmul.f32 %v1883_v55, %v1955_v37  ;;  %v162_v47 = vmul.f32 %v1877_v52, %v1957_v38  ;;  %v164_v60 = vmul.f32 %v1879_v53, %v1957_v38  ;;  %v161_v61 = vmul.f32 %v1881_v54, %v1957_v38 }
  0x8d   :  { %v163_v2 = vmul.f32 %v1883_v55, %v1957_v38  ;;  %v298_v3 = vadd.f32 %v266_v21, %v146_v43  ;;  %v300_v4 = vadd.f32 %v268_v22, %v148_v44  ;;  %v297_v5 = vadd.f32 %v265_v23, %v145_v45 }
  0x8e   :  { %v299_v10 = vadd.f32 %v267_v24, %v147_v46  ;;  %v1979_v11 = vpop.permute.xlu0 %55  ;;  %v150_v25 = vmul.f32 %v1893_v62, %v1955_v37  ;;  %v152_v26 = vmul.f32 %v1895_v63, %v1955_v37  ;;  %v149_v27 = vmul.f32 %v1897_v0, %v1955_v37 }
  0x8f   :  { %v1987_v28 = vadd.f32 %v261_v12, %v141_v41  ;;  %v1989_v29 = vpop.permute.xlu1 %182  ;;  %v154_v21 = vmul.f32 %v1877_v52, %v1979_v11  ;;  %v156_v22 = vmul.f32 %v1879_v53, %v1979_v11  ;;  %v153_v23 = vmul.f32 %v1881_v54, %v1979_v11 }
  0x90   :  { %v155_v24 = vmul.f32 %v1883_v55, %v1979_v11  ;;  %v282_v31 = vmul.f32 %v1869_v48, %v1989_v29  ;;  %v284_v12 = vmul.f32 %v1871_v49, %v1989_v29  ;;  %v281_v41 = vmul.f32 %v1873_v50, %v1989_v29 }
  0x91   :  { %v283_v52 = vmul.f32 %v1875_v51, %v1989_v29  ;;  %v306_v43 = vadd.f32 %v274_v6, %v154_v21  ;;  %v308_v53 = vadd.f32 %v276_v7, %v156_v22  ;;  %v305_v44 = vadd.f32 %v273_v8, %v153_v23 }
  0x92   :  { %v307_v45 = vadd.f32 %v275_v9, %v155_v24  ;;  %v2007_v54 = vpop.permute.xlu0 %328  ;;  %v314_v46 = vadd.f32 %v282_v31, %v162_v47  ;;  %v316_v55 = vadd.f32 %v284_v12, %v164_v60  ;;  %v313_v18 = vadd.f32 %v281_v41, %v161_v61 }
  0x93   :  { %v315_v19 = vadd.f32 %v283_v52, %v163_v2  ;;  %v350_v48 = vadd.f32 %v2007_v54, %v298_v3  ;;  %v352_v49 = vadd.f32 %v2007_v54, %v300_v4  ;;  %v349_v17 = vadd.f32 %v2007_v54, %v297_v5 }
  0x94   :  { %v351_v50 = vadd.f32 %v2007_v54, %v299_v10  ;;  %v2013_v58 = vpop.permute.xlu1 %323  ;;  %v302_v51 = vadd.f32 %v270_v30, %v150_v25  ;;  %v304_v6 = vadd.f32 %v272_v32, %v152_v26  ;;  %v301_v7 = vadd.f32 %v269_v42, %v149_v27 }
  0x95   :  { %v143_v8 = vmul.f32 %v1899_v1, %v1929_v20  ;;  %v342_v9 = vadd.f32 %v2013_v58, %v290_v33  ;;  %v382_v47 = vmax.f32 %v350_v48, 0.0  ;;  %v344_v60 = vadd.f32 %v2013_v58, %v292_v34 }
  0x96   :  { %v384_v61 = vmax.f32 %v352_v49, 0.0  ;;  %v341_v2 = vadd.f32 %v2013_v58, %v289_v35  ;;  %v381_v3 = vmax.f32 %v349_v17, 0.0  ;;  %v343_v4 = vadd.f32 %v2013_v58, %v291_v36 }
  0x97   :  { %v383_v5 = vmax.f32 %v351_v50, 0.0  ;;  %v374_v10 = vmax.f32 %v342_v9, 0.0  ;;  %v376_v21 = vmax.f32 %v344_v60, 0.0  ;;  %v346_v30 = vadd.f32 %v2013_v58, %v294_v39 }
  0x98   :  { %v354_v32 = vadd.f32 %v2007_v54, %v302_v51  ;;  %v2023_v42 = vpop.permute.xlu1 %333  ;;  %v373_v20 = vmax.f32 %v341_v2, 0.0  ;;  %v375_v33 = vmax.f32 %v343_v4, 0.0  ;;  %v348_v25 = vadd.f32 %v2013_v58, %v296_v40 }
  0x99   :  { %v356_v34 = vadd.f32 %v2007_v54, %v304_v6  ;;  %v1626_v26 = vpack.c.bf16 %v382_v47, %v374_v10  ;;  %v1634_v35 = vpack.c.bf16 %v384_v61, %v376_v21  ;;  %v358_v17 = vadd.f32 %v2023_v42, %v306_v43 }
  0x9a   :  { %v360_v36 = vadd.f32 %v2023_v42, %v308_v53  ;;  %v1628_v27 = vpack.c.bf16 %v381_v3, %v373_v20  ;;  %v1636_v22 = vpack.c.bf16 %v383_v5, %v375_v33  ;;  %v357_v39 = vadd.f32 %v2023_v42, %v305_v44 }
  0x9b   :  { %v359_v23 = vadd.f32 %v2023_v42, %v307_v45  ;;  %1627 = vmatprep.subr.bf16.mxu0 %v1626_v26  ;;  %1635 = vmatprep.subr.bf16.mxu1 %v1634_v35  ;;  %v390_v24 = vmax.f32 %v358_v17, 0.0  ;;  %v378_v12 = vmax.f32 %v346_v30, 0.0  ;;  %v386_v40 = vmax.f32 %v354_v32, 0.0 }
  0x9c   :  { %v392_v31 = vmax.f32 %v360_v36, 0.0  ;;  %v2031_v41 = vpop.permute.xlu1 %338  ;;  %1629 = vmatpush1.bf16.msra.mxu0 %v1628_v27  ;;  %1637 = vmatpush1.bf16.msra.mxu1 %v1636_v22  ;;  %v389_v52 = vmax.f32 %v357_v39, 0.0  ;;  %v380_v48 = vmax.f32 %v348_v25, 0.0  ;;  %v388_v53 = vmax.f32 %v356_v34, 0.0 }
  0x9d   :  { %v391_v43 = vmax.f32 %v359_v23, 0.0  ;;  %v366_v49 = vadd.f32 %v2031_v41, %v314_v46  ;;  %v368_v44 = vadd.f32 %v2031_v41, %v316_v55  ;;  %v365_v45 = vadd.f32 %v2031_v41, %v313_v18 }
  0x9e   :  { %v367_v50 = vadd.f32 %v2031_v41, %v315_v19  ;;  %v1642_v51 = vpack.c.bf16 %v386_v40, %v378_v12  ;;  %v1650_v6 = vpack.c.bf16 %v388_v53, %v380_v48  ;;  %v345_v9 = vadd.f32 %v2013_v58, %v1987_v28  ;;  %v2302_v40 = vld [vmem:[#allocation6_spill] sm:$0xff] }
  0x9f   :  { %v353_v47 = vadd.f32 %v2007_v54, %v301_v7  ;;  %v398_v60 = vmax.f32 %v366_v49, 0.0  ;;  %v400_v61 = vmax.f32 %v368_v44, 0.0  ;;  %v397_v2 = vmax.f32 %v365_v45, 0.0 }
  0xa0   :  { %v399_v3 = vmax.f32 %v367_v50, 0.0  ;;  %v377_v4 = vmax.f32 %v345_v9, 0.0  ;;  %v151_v46 = vmul.f32 %v1899_v1, %v1955_v37  ;;  %v271_v18 = vmul.f32 %v1891_v59, %v1915_v14 }
  0xa1   :  { %v385_v5 = vmax.f32 %v353_v47, 0.0  ;;  %v1630_v19 = vpack.c.bf16 %v398_v60, %v390_v24  ;;  %v1638_v55 = vpack.c.bf16 %v400_v61, %v392_v31  ;;  %v1632_v10 = vpack.c.bf16 %v397_v2, %v389_v52  ;;  %v2301_v31 = vld [vmem:[#allocation5_spill] sm:$0xff] }
  0xa2   :  { %v1640_v21 = vpack.c.bf16 %v399_v3, %v391_v43  ;;  %v295_v28 = vadd.f32 %v1913_v13, %v143_v8  ;;  %v303_v7 = vadd.f32 %v271_v18, %v151_v46  ;;  %v158_v32 = vmul.f32 %v1893_v62, %v1979_v11  ;;  %v2056_v13 = vld [vmem:[%s2287_s3] sm:$0xff] }
  0xa3   :  { %v1644_v30 = vpack.c.bf16 %v385_v5, %v377_v4  ;;  %1631 = vmatprep.subr.bf16.mxu0 %v1630_v19  ;;  %1639 = vmatprep.subr.bf16.mxu1 %v1638_v55  ;;  %v166_v20 = vmul.f32 %v1893_v62, %v1957_v38  ;;  %v286_v37 = vmul.f32 %v1885_v56, %v1989_v29  ;;  %v2300_v22 = vmov 0.0   ;;  %v2133_v19 = vpop.permute.xlu0 %415  ;;  %v2135_v55 = vpop.permute.xlu1 %420 }
  0xa4   :  { %v160_v14 = vmul.f32 %v1895_v63, %v1979_v11  ;;  %1633 = vmatpush1.bf16.msra.mxu0 %v1632_v10  ;;  %1641 = vmatpush1.bf16.msra.mxu1 %v1640_v21  ;;  %v347_v8 = vadd.f32 %v2013_v58, %v295_v28  ;;  %v355_v33 = vadd.f32 %v2007_v54, %v303_v7 }
  0xa5   :  { %v310_v62 = vadd.f32 %v1918_v15, %v158_v32  ;;  %1643 = vmatprep.subr.bf16.mxu0 %v1642_v51  ;;  %1651 = vmatprep.subr.bf16.mxu1 %v1650_v6  ;;  %v318_v56 = vadd.f32 %v286_v37, %v166_v20  ;;  %v168_v25 = vmul.f32 %v1895_v63, %v1957_v38  ;;  %v2303_v51 = vld [vmem:[#allocation7_spill] sm:$0xff] }
  0xa6   :  { %v288_v34 = vmul.f32 %v1887_v57, %v1989_v29  ;;  %v379_v26 = vmax.f32 %v347_v8, 0.0  ;;  %v387_v35 = vmax.f32 %v355_v33, 0.0  ;;  %v312_v36 = vadd.f32 %v1921_v16, %v160_v14  ;;  %v406_v16 = vld [vmem:[%s2287_s3 + $0x8] sm:$0xff] }
  0xa7   :  { %v362_v17 = vadd.f32 %v2023_v42, %v310_v62  ;;  %1590 = vmatmul.mubr.msk.f32.vlgmr.msra.gmra.mrb[0].mxu0 %vm433_vm0, %v2056_v13  ;;  %1594 = vmatmul.mubr.msk.f32.vlgmr.msra.gmra.mrb[0].mxu1 %vm433_vm0, %v2056_v13  ;;  %v370_v58 = vadd.f32 %v2031_v41, %v318_v56  ;;  %v157_v63 = vmul.f32 %v1897_v0, %v1979_v11 }
  0xa8   :  { %v320_v15 = vadd.f32 %v288_v34, %v168_v25  ;;  %1645 = vmatpush1.bf16.msra.mxu0 %v1644_v30  ;;  %v1652_v57 = vpack.c.bf16 %v387_v35, %v379_v26  ;;  %v364_v27 = vadd.f32 %v2023_v42, %v312_v36  ;;  %516 = vmatprep.mubr.f32.mxu0 %v2300_v22 }
  0xa9   :  { %v394_v54 = vmax.f32 %v362_v17, 0.0  ;;  %v165_v39 = vmul.f32 %v1897_v0, %v1957_v38  ;;  %v402_v23 = vmax.f32 %v370_v58, 0.0  ;;  %605 = vmatprep.mubr.f32.mxu1 %v2300_v22  ;;  %v285_v12 = vmul.f32 %v2301_v31, %v1989_v29  ;;  %v2148_v31 = vpop.permute.xlu1 %430 }
  0xaa   :  { %v372_v24 = vadd.f32 %v2031_v41, %v320_v15  ;;  %v309_v52 = vadd.f32 %v2302_v40, %v157_v63  ;;  %1653 = vmatpush1.bf16.msra.mxu1 %v1652_v57  ;;  %v396_v43 = vmax.f32 %v364_v27, 0.0  ;;  %v159_v48 = vmul.f32 %v1899_v1, %v1979_v11 }
  0xab   :  { %v167_v53 = vmul.f32 %v1899_v1, %v1957_v38  ;;  %v287_v0 = vmul.f32 %v1891_v59, %v1989_v29  ;;  %v1646_v49 = vpack.c.bf16 %v402_v23, %v394_v54  ;;  %1591 = vmatmul.mubr.msk.f32.gmra.mrb[2].mxu0 %vm433_vm0, %v406_v16  ;;  %1595 = vmatmul.mubr.msk.f32.gmra.mrb[2].mxu1 %vm433_vm0, %v406_v16  ;;  %v407_v59 = vld [vmem:[%s2287_s3 + $0x10] sm:$0xff]  ;;  %v2145_v23 = vpop.permute.xlu0 %425 }
  0xac   :  { %v404_v44 = vmax.f32 %v372_v24, 0.0  ;;  %v317_v45 = vadd.f32 %v285_v12, %v165_v39  ;;  %v361_v50 = vadd.f32 %v2023_v42, %v309_v52  ;;  %v311_v6 = vadd.f32 %v2303_v51, %v159_v48  ;;  %522 = vmatprep.mubr.f32.mxu0 %v2300_v22  ;;  %611 = vmatprep.mubr.f32.mxu1 %v2300_v22 }
  0xad   :  { %v319_v9 = vadd.f32 %v287_v0, %v167_v53  ;;  %1647 = vmatprep.subr.bf16.mxu0 %v1646_v49 }
  0xae   :  { %v1654_v1 = vpack.c.bf16 %v404_v44, %v396_v43  ;;  %v369_v38 = vadd.f32 %v2031_v41, %v317_v45  ;;  %v363_v11 = vadd.f32 %v2023_v42, %v311_v6  ;;  %v393_v47 = vmax.f32 %v361_v50, 0.0  ;;  %v408_v42 = vld [vmem:[%s2287_s3 + $0x18] sm:$0xff] }
  0xaf   :  { %v371_v29 = vadd.f32 %v2031_v41, %v319_v9  ;;  %1592 = vmatmul.mubr.msk.f32.gmra.mrb[4].mxu0 %vm433_vm0, %v407_v59  ;;  %1596 = vmatmul.mubr.msk.f32.gmra.mrb[4].mxu1 %vm433_vm0, %v407_v59 }
  0xb0   :  { %1655 = vmatprep.subr.bf16.mxu1 %v1654_v1  ;;  %v401_v60 = vmax.f32 %v369_v38, 0.0  ;;  %v395_v61 = vmax.f32 %v363_v11, 0.0  ;;  %528 = vmatprep.mubr.f32.mxu0 %v2300_v22 }
  0xb1   :  { %v403_v2 = vmax.f32 %v371_v29, 0.0  ;;  %617 = vmatprep.mubr.f32.mxu1 %v2300_v22 }
  0xb2   :  { %v1648_v3 = vpack.c.bf16 %v401_v60, %v393_v47 }
  0xb3   :  { %v1656_v4 = vpack.c.bf16 %v403_v2, %v395_v61  ;;  %1593 = vmatmul.mubr.msk.f32.gmra.mrb[6].mxu0 %vm433_vm0, %v408_v42  ;;  %1597 = vmatmul.mubr.msk.f32.gmra.mrb[6].mxu1 %vm433_vm0, %v408_v42 }
  0xb4   :  { %1649 = vmatpush1.bf16.msra.mxu0 %v1648_v3  ;;  %688 = vmatprep.mubr.f32.mxu0 %v2300_v22 }
  0xb5   :  { %1657 = vmatpush1.bf16.msra.mxu1 %v1656_v4  ;;  %777 = vmatprep.mubr.f32.mxu1 %v2300_v22 }
  0xb7   :  { %1598 = vmatmul.mubr.msk.f32.vlgmr.msra.gmra.mrb[8].mxu0 %vm433_vm0, %v2056_v13 }
  0xb8   :  { %1602 = vmatmul.mubr.msk.f32.vlgmr.msra.gmra.mrb[8].mxu1 %vm433_vm0, %v2056_v13  ;;  %694 = vmatprep.mubr.f32.mxu0 %v2300_v22 }
  0xb9   :  { %783 = vmatprep.mubr.f32.mxu1 %v2300_v22 }
  0xbb   :  { %1599 = vmatmul.mubr.msk.f32.gmra.mrb[10].mxu0 %vm433_vm0, %v406_v16 }
  0xbc   :  { %1603 = vmatmul.mubr.msk.f32.gmra.mrb[10].mxu1 %vm433_vm0, %v406_v16  ;;  %700 = vmatprep.mubr.f32.mxu0 %v2300_v22 }
  0xbd   :  { %789 = vmatprep.mubr.f32.mxu1 %v2300_v22 }
  0xbf   :  { %1600 = vmatmul.mubr.msk.f32.gmra.mrb[12].mxu0 %vm433_vm0, %v407_v59 }
  0xc0   :  { %1604 = vmatmul.mubr.msk.f32.gmra.mrb[12].mxu1 %vm433_vm0, %v407_v59  ;;  %706 = vmatprep.mubr.f32.mxu0 %v2300_v22 }
  0xc1   :  { %795 = vmatprep.mubr.f32.mxu1 %v2300_v22 }
  0xc3   :  { %1601 = vmatmul.mubr.msk.f32.gmra.mrb[14].mxu0 %vm433_vm0, %v408_v42 }
  0xc4   :  { %1605 = vmatmul.mubr.msk.f32.gmra.mrb[14].mxu1 %vm433_vm0, %v408_v42  ;;  %938 = vmatprep.mubr.f32.mxu0 %v2300_v22 }
  0xc5   :  { %1027 = vmatprep.mubr.f32.mxu1 %v2300_v22 }
 0x17a   :  { %v512_v41 = vpop.f32.mrb[0].mxu0  ;;  %v601_v5 = vpop.f32.mrb[0].mxu1 }
 0x17b   :  { %v514_v46 = vpop.f32.mrb[1].mxu0  ;;  %v603_v18 = vpop.f32.mrb[1].mxu1  ;;  %v513_v10 = vadd.f32 %v512_v41, %v2133_v19  ;;  %v602_v21 = vadd.f32 %v601_v5, %v2133_v19 }
 0x17c   :  { %v515_v30 = vadd.f32 %v514_v46, %v2133_v19  ;;  %v604_v28 = vadd.f32 %v603_v18, %v2133_v19 }
 0x17d   :  { %v802_v62 = vmax.f32 %v513_v10, 0.0  ;;  %v804_v56 = vmax.f32 %v602_v21, 0.0 }
 0x17e   :  { %v518_v7 = vpop.f32.mrb[2].mxu0  ;;  %v607_v32 = vpop.f32.mrb[2].mxu1  ;;  %v803_v26 = vmax.f32 %v515_v30, 0.0  ;;  %v805_v35 = vmax.f32 %v604_v28, 0.0 }
 0x17f   :  { %v519_v20 = vadd.f32 %v518_v7, %v2135_v55  ;;  %v608_v37 = vadd.f32 %v607_v32, %v2135_v55  ;;  %v520_v14 = vpop.f32.mrb[3].mxu0  ;;  %v609_v13 = vpop.f32.mrb[3].mxu1  ;;  %v2165_v32 = vld [vmem:[%s2289_s5] sm:$0xff] }
 0x180   :  { %v521_v8 = vadd.f32 %v520_v14, %v2135_v55  ;;  %v610_v33 = vadd.f32 %v609_v13, %v2135_v55 }
 0x181   :  { %v810_v25 = vmax.f32 %v519_v20, 0.0  ;;  %v812_v34 = vmax.f32 %v608_v37, 0.0 }
 0x182   :  { %v811_v17 = vmax.f32 %v521_v8, 0.0  ;;  %v813_v36 = vmax.f32 %v610_v33, 0.0  ;;  %v524_v58 = vpop.f32.mrb[4].mxu0  ;;  %v613_v57 = vpop.f32.mrb[4].mxu1 }
 0x183   :  { %v1660_v15 = vpack.c.bf16 %v810_v25, %v802_v62  ;;  %v1668_v63 = vpack.c.bf16 %v812_v34, %v804_v56  ;;  %v526_v54 = vpop.f32.mrb[5].mxu0  ;;  %v615_v39 = vpop.f32.mrb[5].mxu1  ;;  %v525_v24 = vadd.f32 %v524_v58, %v2145_v23  ;;  %v614_v12 = vadd.f32 %v613_v57, %v2145_v23 }
 0x184   :  { %v1658_v27 = vpack.c.bf16 %v811_v17, %v803_v26  ;;  %v1666_v16 = vpack.c.bf16 %v813_v36, %v805_v35  ;;  %v527_v40 = vadd.f32 %v526_v54, %v2145_v23  ;;  %v616_v43 = vadd.f32 %v615_v39, %v2145_v23 }
 0x185   :  { %v818_v50 = vmax.f32 %v525_v24, 0.0  ;;  %v820_v9 = vmax.f32 %v614_v12, 0.0 }
 0x186   :  { %1659 = vmatprep.subr.bf16.mxu0 %v1658_v27  ;;  %1667 = vmatprep.subr.bf16.mxu1 %v1666_v16  ;;  %v530_v52 = vpop.f32.mrb[6].mxu0  ;;  %v619_v53 = vpop.f32.mrb[6].mxu1  ;;  %v819_v59 = vmax.f32 %v527_v40, 0.0  ;;  %v821_v29 = vmax.f32 %v616_v43, 0.0 }
 0x187   :  { %1661 = vmatpush1.bf16.msra.mxu0 %v1660_v15  ;;  %1669 = vmatpush1.bf16.msra.mxu1 %v1668_v63  ;;  %v531_v48 = vadd.f32 %v530_v52, %v2148_v31  ;;  %v532_v0 = vpop.f32.mrb[7].mxu0  ;;  %v620_v49 = vadd.f32 %v619_v53, %v2148_v31  ;;  %v621_v45 = vpop.f32.mrb[7].mxu1 }
 0x188   :  { %v533_v44 = vadd.f32 %v532_v0, %v2148_v31  ;;  %v622_v6 = vadd.f32 %v621_v45, %v2148_v31 }
 0x189   :  { %v826_v51 = vmax.f32 %v531_v48, 0.0  ;;  %v828_v1 = vmax.f32 %v620_v49, 0.0  ;;  %v836_v48 = vld [vmem:[%s2289_s5 + $0x10] sm:$0xff] }
 0x18a   :  { %v827_v38 = vmax.f32 %v533_v44, 0.0  ;;  %v690_v11 = vpop.f32.mrb[8].mxu0  ;;  %v829_v60 = vmax.f32 %v622_v6, 0.0 }
 0x18b   :  { %v1664_v47 = vpack.c.bf16 %v826_v51, %v818_v50  ;;  %v779_v61 = vpop.f32.mrb[8].mxu1  ;;  %v692_v2 = vpop.f32.mrb[9].mxu0  ;;  %v1672_v3 = vpack.c.bf16 %v828_v1, %v820_v9  ;;  %v691_v5 = vadd.f32 %v690_v11, %v2133_v19 }
 0x18c   :  { %v1662_v42 = vpack.c.bf16 %v827_v38, %v819_v59  ;;  %v781_v4 = vpop.f32.mrb[9].mxu1  ;;  %v1670_v41 = vpack.c.bf16 %v829_v60, %v821_v29  ;;  %v780_v46 = vadd.f32 %v779_v61, %v2133_v19  ;;  %v693_v18 = vadd.f32 %v692_v2, %v2133_v19 }
 0x18d   :  { %v782_v21 = vadd.f32 %v781_v4, %v2133_v19  ;;  %v806_v13 = vmax.f32 %v691_v5, 0.0 }
 0x18e   :  { %v696_v10 = vpop.f32.mrb[10].mxu0  ;;  %1663 = vmatprep.subr.bf16.mxu0 %v1662_v42  ;;  %1671 = vmatprep.subr.bf16.mxu1 %v1670_v41  ;;  %v808_v33 = vmax.f32 %v780_v46, 0.0  ;;  %v807_v62 = vmax.f32 %v693_v18, 0.0  ;;  %v2226_v41 = vpop.permute.xlu1 %849 }
 0x18f   :  { %v697_v30 = vadd.f32 %v696_v10, %v2135_v55  ;;  %v785_v28 = vpop.f32.mrb[10].mxu1  ;;  %v698_v7 = vpop.f32.mrb[11].mxu0  ;;  %1665 = vmatpush1.bf16.msra.mxu0 %v1664_v47  ;;  %1673 = vmatpush1.bf16.msra.mxu1 %v1672_v3  ;;  %v809_v26 = vmax.f32 %v782_v21, 0.0 }
 0x190   :  { %v786_v20 = vadd.f32 %v785_v28, %v2135_v55  ;;  %v699_v37 = vadd.f32 %v698_v7, %v2135_v55  ;;  %v787_v14 = vpop.f32.mrb[11].mxu1  ;;  %v2223_v3 = vpop.permute.xlu0 %844 }
 0x191   :  { %v814_v8 = vmax.f32 %v697_v30, 0.0  ;;  %v788_v19 = vadd.f32 %v787_v14, %v2135_v55  ;;  %v835_v55 = vld [vmem:[%s2289_s5 + $0x8] sm:$0xff] }
 0x192   :  { %v816_v56 = vmax.f32 %v786_v20, 0.0  ;;  %v815_v25 = vmax.f32 %v699_v37, 0.0  ;;  %v702_v34 = vpop.f32.mrb[12].mxu0  ;;  %1606 = vmatmul.mubr.msk.f32.vlgmr.msra.gmra.mrb[16].mxu0 %vm433_vm0, %v2165_v32  ;;  %1610 = vmatmul.mubr.msk.f32.vlgmr.msra.gmra.mrb[16].mxu1 %vm433_vm0, %v2165_v32 }
 0x193   :  { %v1676_v35 = vpack.c.bf16 %v814_v8, %v806_v13  ;;  %v817_v17 = vmax.f32 %v788_v19, 0.0  ;;  %v791_v36 = vpop.f32.mrb[12].mxu1  ;;  %v704_v58 = vpop.f32.mrb[13].mxu0  ;;  %944 = vmatprep.mubr.f32.mxu0 %v2300_v22  ;;  %1033 = vmatprep.mubr.f32.mxu1 %v2300_v22  ;;  %v703_v27 = vadd.f32 %v702_v34, %v2145_v23 }
 0x194   :  { %v1684_v15 = vpack.c.bf16 %v816_v56, %v808_v33  ;;  %v1674_v63 = vpack.c.bf16 %v815_v25, %v807_v62  ;;  %v793_v57 = vpop.f32.mrb[13].mxu1  ;;  %v792_v16 = vadd.f32 %v791_v36, %v2145_v23  ;;  %v705_v39 = vadd.f32 %v704_v58, %v2145_v23  ;;  %v2235_v36 = vpop.permute.xlu0 %854 }
 0x195   :  { %v1682_v54 = vpack.c.bf16 %v817_v17, %v809_v26  ;;  %v794_v12 = vadd.f32 %v793_v57, %v2145_v23  ;;  %v822_v44 = vmax.f32 %v703_v27, 0.0 }
 0x196   :  { %v708_v24 = vpop.f32.mrb[14].mxu0  ;;  %1607 = vmatmul.mubr.msk.f32.gmra.mrb[18].mxu0 %vm433_vm0, %v835_v55  ;;  %1675 = vmatprep.subr.bf16.mxu0 %v1674_v63  ;;  %v824_v50 = vmax.f32 %v792_v16, 0.0  ;;  %v823_v51 = vmax.f32 %v705_v39, 0.0 }
 0x197   :  { %v709_v40 = vadd.f32 %v708_v24, %v2148_v31  ;;  %v797_v52 = vpop.f32.mrb[14].mxu1  ;;  %1611 = vmatmul.mubr.msk.f32.gmra.mrb[18].mxu1 %vm433_vm0, %v835_v55  ;;  %1683 = vmatprep.subr.bf16.mxu1 %v1682_v54  ;;  %v710_v43 = vpop.f32.mrb[15].mxu0  ;;  %v825_v59 = vmax.f32 %v794_v12, 0.0 }
 0x198   :  { %v798_v53 = vadd.f32 %v797_v52, %v2148_v31  ;;  %v711_v0 = vadd.f32 %v710_v43, %v2148_v31  ;;  %v799_v49 = vpop.f32.mrb[15].mxu1  ;;  %1677 = vmatpush1.bf16.msra.mxu0 %v1676_v35  ;;  %1685 = vmatpush1.bf16.msra.mxu1 %v1684_v15  ;;  %v2238_v54 = vpop.permute.xlu1 %859 }
 0x199   :  { %v830_v23 = vmax.f32 %v709_v40, 0.0  ;;  %v800_v45 = vadd.f32 %v799_v49, %v2148_v31  ;;  %950 = vmatprep.mubr.f32.mxu0 %v2300_v22  ;;  %1039 = vmatprep.mubr.f32.mxu1 %v2300_v22  ;;  %v837_v31 = vld [vmem:[%s2289_s5 + $0x18] sm:$0xff] }
 0x19a   :  { %v832_v6 = vmax.f32 %v798_v53, 0.0  ;;  %v831_v9 = vmax.f32 %v711_v0, 0.0  ;;  %1608 = vmatmul.mubr.msk.f32.gmra.mrb[20].mxu0 %vm433_vm0, %v836_v48 }
 0x19b   :  { %v1680_v1 = vpack.c.bf16 %v830_v23, %v822_v44  ;;  %v833_v38 = vmax.f32 %v800_v45, 0.0  ;;  %1612 = vmatmul.mubr.msk.f32.gmra.mrb[20].mxu1 %vm433_vm0, %v836_v48  ;;  %956 = vmatprep.mubr.f32.mxu0 %v2300_v22 }
 0x19c   :  { %v1688_v11 = vpack.c.bf16 %v832_v6, %v824_v50  ;;  %v1678_v29 = vpack.c.bf16 %v831_v9, %v823_v51  ;;  %1045 = vmatprep.mubr.f32.mxu1 %v2300_v22 }
 0x19d   :  { %v1686_v47 = vpack.c.bf16 %v833_v38, %v825_v59 }
 0x19e   :  { %1609 = vmatmul.mubr.msk.f32.gmra.mrb[22].mxu0 %vm433_vm0, %v837_v31  ;;  %1679 = vmatprep.subr.bf16.mxu0 %v1678_v29 }
 0x19f   :  { %1613 = vmatmul.mubr.msk.f32.gmra.mrb[22].mxu1 %vm433_vm0, %v837_v31  ;;  %1687 = vmatprep.subr.bf16.mxu1 %v1686_v47 }
 0x1a0   :  { %1681 = vmatpush1.bf16.msra.mxu0 %v1680_v1  ;;  %1689 = vmatpush1.bf16.msra.mxu1 %v1688_v11 }
 0x1a1   :  { %1116 = vmatprep.mubr.f32.mxu0 %v2300_v22  ;;  %1205 = vmatprep.mubr.f32.mxu1 %v2300_v22 }
 0x1a3   :  { %1614 = vmatmul.mubr.msk.f32.vlgmr.msra.gmra.mrb[24].mxu0 %vm433_vm0, %v2165_v32  ;;  %1618 = vmatmul.mubr.msk.f32.vlgmr.msra.gmra.mrb[24].mxu1 %vm433_vm0, %v2165_v32 }
 0x1a4   :  { %1122 = vmatprep.mubr.f32.mxu0 %v2300_v22  ;;  %1211 = vmatprep.mubr.f32.mxu1 %v2300_v22 }
 0x1a7   :  { %1615 = vmatmul.mubr.msk.f32.gmra.mrb[26].mxu0 %vm433_vm0, %v835_v55  ;;  %1619 = vmatmul.mubr.msk.f32.gmra.mrb[26].mxu1 %vm433_vm0, %v835_v55 }
 0x1a8   :  { %1128 = vmatprep.mubr.f32.mxu0 %v2300_v22  ;;  %1217 = vmatprep.mubr.f32.mxu1 %v2300_v22 }
 0x1ab   :  { %1616 = vmatmul.mubr.msk.f32.gmra.mrb[28].mxu0 %vm433_vm0, %v836_v48  ;;  %1620 = vmatmul.mubr.msk.f32.gmra.mrb[28].mxu1 %vm433_vm0, %v836_v48 }
 0x1ac   :  { %1134 = vmatprep.mubr.f32.mxu0 %v2300_v22  ;;  %1223 = vmatprep.mubr.f32.mxu1 %v2300_v22 }
 0x1af   :  { %1617 = vmatmul.mubr.msk.f32.gmra.mrb[30].mxu0 %vm433_vm0, %v837_v31  ;;  %1621 = vmatmul.mubr.msk.f32.gmra.mrb[30].mxu1 %vm433_vm0, %v837_v31 }
 0x1b0   :  { %1336 = vmatprep.mubr.f32.mxu0 %v2300_v22  ;;  %1407 = vmatprep.mubr.f32.mxu1 %v2300_v22 }
 0x265   :  { %v940_v60 = vpop.f32.mrb[16].mxu0  ;;  %v1029_v61 = vpop.f32.mrb[16].mxu1 }
 0x266   :  { %v942_v2 = vpop.f32.mrb[17].mxu0  ;;  %v1031_v42 = vpop.f32.mrb[17].mxu1  ;;  %v941_v4 = vadd.f32 %v940_v60, %v2223_v3  ;;  %v1030_v5 = vadd.f32 %v1029_v61, %v2223_v3 }
 0x267   :  { %v943_v46 = vadd.f32 %v942_v2, %v2223_v3  ;;  %v1032_v10 = vadd.f32 %v1031_v42, %v2223_v3 }
 0x268   :  { %v1230_v37 = vmax.f32 %v941_v4, 0.0  ;;  %v1232_v8 = vmax.f32 %v1030_v5, 0.0 }
 0x269   :  { %v946_v18 = vpop.f32.mrb[18].mxu0  ;;  %v1231_v19 = vmax.f32 %v943_v46, 0.0  ;;  %v1233_v25 = vmax.f32 %v1032_v10, 0.0 }
 0x26a   :  { %v947_v21 = vadd.f32 %v946_v18, %v2226_v41  ;;  %v1035_v30 = vpop.f32.mrb[18].mxu1  ;;  %v948_v28 = vpop.f32.mrb[19].mxu0  ;;  %v1262_v18 = vld [vmem:[%s2291_s7] sm:$0x7]  ;;  %s1759_s7 = smov [#allocation2]  }
 0x26b   :  { %v1036_v7 = vadd.f32 %v1035_v30, %v2226_v41  ;;  %v949_v32 = vadd.f32 %v948_v28, %v2226_v41  ;;  %v1037_v20 = vpop.f32.mrb[19].mxu1  ;;  %s1582_s14 = sshll.u32 %s1759_s7, 4  ;;  %s1583_s14 = int_to_ptr.vmem [resolvable:$true] %s1582_s14 }
 0x26c   :  { %v1238_v14 = vmax.f32 %v947_v21, 0.0  ;;  %v1038_v13 = vadd.f32 %v1037_v20, %v2226_v41  ;;  %s1732_s2 = scalar_lea.vmem %s1583_s14, 512  ;;  %p1737_p1 = scmp.lt.s32.totalorder %s1583_s14, %s1583_s14 }
 0x26d   :  { %v1240_v33 = vmax.f32 %v1036_v7, 0.0  ;;  %v1239_v62 = vmax.f32 %v949_v32, 0.0  ;;  %v952_v56 = vpop.f32.mrb[20].mxu0  ;;  %p1733_p0 = scmp.ne.s32.totalorder %s1583_s14, %s1732_s2  ;;  %p1738_p2 = scmp.lt.s32.totalorder %s1732_s2, %s1732_s2 }
 0x26e   :  { %v1692_v34 = vpack.c.bf16 %v1238_v14, %v1230_v37  ;;  %v1241_v26 = vmax.f32 %v1038_v13, 0.0  ;;  %v1041_v35 = vpop.f32.mrb[20].mxu1  ;;  %v954_v17 = vpop.f32.mrb[21].mxu0  ;;  %v953_v57 = vadd.f32 %v952_v56, %v2235_v36 }
 0x26f   :  { %v1700_v58 = vpack.c.bf16 %v1240_v33, %v1232_v8  ;;  %v1690_v55 = vpack.c.bf16 %v1239_v62, %v1231_v19  ;;  %v1043_v15 = vpop.f32.mrb[21].mxu1  ;;  %v1042_v27 = vadd.f32 %v1041_v35, %v2235_v36  ;;  %v955_v16 = vadd.f32 %v954_v17, %v2235_v36  ;;  %p1739_p3 = por %p1738_p2, %p1737_p1 }
 0x270   :  { %v1698_v63 = vpack.c.bf16 %v1241_v26, %v1233_v25  ;;  %v1044_v24 = vadd.f32 %v1043_v15, %v2235_v36  ;;  %v1246_v0 = vmax.f32 %v953_v57, 0.0 }
 0x271   :  { %v958_v39 = vpop.f32.mrb[22].mxu0  ;;  %1691 = vmatprep.subr.bf16.mxu0 %v1690_v55  ;;  %v1248_v23 = vmax.f32 %v1042_v27, 0.0  ;;  %v1247_v45 = vmax.f32 %v955_v16, 0.0  ;;  %p1740_p4 = pnand %p1739_p3, %p1733_p0 }
 0x272   :  { %v959_v12 = vadd.f32 %v958_v39, %v2238_v54  ;;  %v1047_v40 = vpop.f32.mrb[22].mxu1  ;;  %1699 = vmatprep.subr.bf16.mxu1 %v1698_v63  ;;  %v960_v52 = vpop.f32.mrb[23].mxu0  ;;  %1693 = vmatpush1.bf16.msra.mxu0 %v1692_v34  ;;  %v1249_v6 = vmax.f32 %v1044_v24, 0.0 }
 0x273   :  { %v1048_v43 = vadd.f32 %v1047_v40, %v2238_v54  ;;  %v961_v48 = vadd.f32 %v960_v52, %v2238_v54  ;;  %v1049_v53 = vpop.f32.mrb[23].mxu1  ;;  %1701 = vmatpush1.bf16.msra.mxu1 %v1700_v58 }
 0x274   :  { %v1254_v49 = vmax.f32 %v959_v12, 0.0  ;;  %v1050_v44 = vadd.f32 %v1049_v53, %v2238_v54 }
 0x275   :  { %v1256_v50 = vmax.f32 %v1048_v43, 0.0  ;;  %v1255_v51 = vmax.f32 %v961_v48, 0.0 }
 0x276   :  { %v1696_v9 = vpack.c.bf16 %v1254_v49, %v1246_v0  ;;  %v1257_v59 = vmax.f32 %v1050_v44, 0.0  ;;  %v1118_v1 = vpop.f32.mrb[24].mxu0  ;;  %v1207_v38 = vpop.f32.mrb[24].mxu1 }
 0x277   :  { %v1704_v31 = vpack.c.bf16 %v1256_v50, %v1248_v23  ;;  %v1694_v11 = vpack.c.bf16 %v1255_v51, %v1247_v45  ;;  %v1120_v29 = vpop.f32.mrb[25].mxu0  ;;  %v1209_v47 = vpop.f32.mrb[25].mxu1  ;;  %v1119_v61 = vadd.f32 %v1118_v1, %v2223_v3  ;;  %v1208_v2 = vadd.f32 %v1207_v38, %v2223_v3 }
 0x278   :  { %v1702_v60 = vpack.c.bf16 %v1257_v59, %v1249_v6  ;;  %v1121_v42 = vadd.f32 %v1120_v29, %v2223_v3  ;;  %v1210_v4 = vadd.f32 %v1209_v47, %v2223_v3 }
 0x279   :  { %1695 = vmatprep.subr.bf16.mxu0 %v1694_v11  ;;  %v1234_v3 = vmax.f32 %v1119_v61, 0.0  ;;  %v1236_v20 = vmax.f32 %v1208_v2, 0.0 }
 0x27a   :  { %v1124_v5 = vpop.f32.mrb[26].mxu0  ;;  %v1213_v46 = vpop.f32.mrb[26].mxu1  ;;  %1703 = vmatprep.subr.bf16.mxu1 %v1702_v60  ;;  %1697 = vmatpush1.bf16.msra.mxu0 %v1696_v9  ;;  %v1235_v13 = vmax.f32 %v1121_v42, 0.0  ;;  %v1237_v8 = vmax.f32 %v1210_v4, 0.0 }
 0x27b   :  { %v1125_v10 = vadd.f32 %v1124_v5, %v2226_v41  ;;  %v1214_v21 = vadd.f32 %v1213_v46, %v2226_v41  ;;  %v1126_v30 = vpop.f32.mrb[27].mxu0  ;;  %v1215_v28 = vpop.f32.mrb[27].mxu1  ;;  %1705 = vmatpush1.bf16.msra.mxu1 %v1704_v31 }
 0x27c   :  { %v1127_v7 = vadd.f32 %v1126_v30, %v2226_v41  ;;  %v1216_v32 = vadd.f32 %v1215_v28, %v2226_v41 }
 0x27d   :  { %v1242_v37 = vmax.f32 %v1125_v10, 0.0  ;;  %v1244_v14 = vmax.f32 %v1214_v21, 0.0  ;;  %1622 = vmatmul.mubr.msk.f32.vlgmr.msra.gmra.mrb[32].mxu0 %vm433_vm0, %v1262_v18 }
 0x27e   :  { %v1243_v19 = vmax.f32 %v1127_v7, 0.0  ;;  %v1245_v33 = vmax.f32 %v1216_v32, 0.0  ;;  %v1130_v62 = vpop.f32.mrb[28].mxu0  ;;  %v1219_v56 = vpop.f32.mrb[28].mxu1  ;;  %1623 = vmatmul.mubr.msk.f32.vlgmr.msra.gmra.mrb[32].mxu1 %vm433_vm0, %v1262_v18  ;;  %1478 = vmatprep.mubr.f32.mxu0 %v2300_v22 }
 0x27f   :  { %v1708_v25 = vpack.c.bf16 %v1242_v37, %v1234_v3  ;;  %v1716_v34 = vpack.c.bf16 %v1244_v14, %v1236_v20  ;;  %v1132_v26 = vpop.f32.mrb[29].mxu0  ;;  %v1221_v41 = vpop.f32.mrb[29].mxu1  ;;  %1549 = vmatprep.mubr.f32.mxu1 %v2300_v22  ;;  %v1131_v58 = vadd.f32 %v1130_v62, %v2235_v36  ;;  %v1220_v55 = vadd.f32 %v1219_v56, %v2235_v36 }
 0x280   :  { %v1706_v35 = vpack.c.bf16 %v1243_v19, %v1235_v13  ;;  %v1714_v17 = vpack.c.bf16 %v1245_v33, %v1237_v8  ;;  %v1133_v15 = vadd.f32 %v1132_v26, %v2235_v36  ;;  %v1222_v63 = vadd.f32 %v1221_v41, %v2235_v36 }
 0x281   :  { %v1250_v52 = vmax.f32 %v1131_v58, 0.0  ;;  %v1252_v43 = vmax.f32 %v1220_v55, 0.0 }
 0x282   :  { %v1136_v57 = vpop.f32.mrb[30].mxu0  ;;  %v1225_v27 = vpop.f32.mrb[30].mxu1  ;;  %1707 = vmatprep.subr.bf16.mxu0 %v1706_v35  ;;  %1715 = vmatprep.subr.bf16.mxu1 %v1714_v17  ;;  %v1251_v53 = vmax.f32 %v1133_v15, 0.0  ;;  %v1253_v0 = vmax.f32 %v1222_v63, 0.0 }
 0x283   :  { %v1137_v16 = vadd.f32 %v1136_v57, %v2238_v54  ;;  %v1226_v39 = vadd.f32 %v1225_v27, %v2238_v54  ;;  %v1138_v24 = vpop.f32.mrb[31].mxu0  ;;  %v1227_v22 = vpop.f32.mrb[31].mxu1  ;;  %1709 = vmatpush1.bf16.msra.mxu0 %v1708_v25  ;;  %1717 = vmatpush1.bf16.msra.mxu1 %v1716_v34 }
 0x284   :  { %v1139_v12 = vadd.f32 %v1138_v24, %v2238_v54  ;;  %v1228_v40 = vadd.f32 %v1227_v22, %v2238_v54  ;;  %v1267_v54 = vpop.permute.xlu0 %1266 }
 0x285   :  { %v1258_v48 = vmax.f32 %v1137_v16, 0.0  ;;  %v1260_v36 = vmax.f32 %v1226_v39, 0.0 }
 0x286   :  { %v1259_v49 = vmax.f32 %v1139_v12, 0.0  ;;  %v1261_v44 = vmax.f32 %v1228_v40, 0.0 }
 0x287   :  { %v1712_v23 = vpack.c.bf16 %v1258_v48, %v1250_v52  ;;  %v1720_v45 = vpack.c.bf16 %v1260_v36, %v1252_v43 }
 0x288   :  { %v1710_v50 = vpack.c.bf16 %v1259_v49, %v1251_v53  ;;  %v1718_v51 = vpack.c.bf16 %v1261_v44, %v1253_v0 }
 0x28a   :  { %1711 = vmatprep.subr.bf16.mxu0 %v1710_v50  ;;  %1719 = vmatprep.subr.bf16.mxu1 %v1718_v51 }
 0x28b   :  { %1713 = vmatpush1.bf16.msra.mxu0 %v1712_v23  ;;  %1721 = vmatpush1.bf16.msra.mxu1 %v1720_v45 }
 0x28e   :  { %1624 = vmatmul.mubr.msk.f32.vlgmr.msra.gmra.mrb[34].mxu0 %vm433_vm0, %v1262_v18  ;;  %1625 = vmatmul.mubr.msk.f32.vlgmr.msra.gmra.mrb[34].mxu1 %vm433_vm0, %v1262_v18 }
 0x350   :  { %v1338_v6 = vpop.f32.mrb[32].mxu0 }
 0x351   :  { %v1339_v9 = vadd.f32 %v1338_v6, %v1267_v54  ;;  %v1409_v59 = vpop.f32.mrb[32].mxu1  ;;  %v1340_v1 = vpop.f32.mrb[33].mxu0 }
 0x352   :  { %v1410_v38 = vadd.f32 %v1409_v59, %v1267_v54  ;;  %v1341_v31 = vadd.f32 %v1340_v1, %v1267_v54  ;;  %v1411_v11 = vpop.f32.mrb[33].mxu1 }
 0x353   :  { %v1412_v29 = vadd.f32 %v1411_v11, %v1267_v54 }
 0x354   :  { %v1564_v47 = vcombine.low %v1339_v9, %v1341_v31 }
 0x355   :  { %v1565_v60 = vcombine.low %v1410_v38, %v1412_v29 }
 0x356   :  { %1572 = vst [vmem:[#allocation2] sm:$0x77] %v1564_v47 }
 0x357   :  { %1573 = vst [vmem:[#allocation2 + $0x8] sm:$0x77] %v1565_v60 }
 0x361   :  { %v1480_v61 = vpop.f32.mrb[34].mxu0  ;;  %v1551_v2 = vpop.f32.mrb[34].mxu1 }
 0x362   :  { %v1481_v42 = vadd.f32 %v1480_v61, %v1267_v54  ;;  %v1552_v4 = vadd.f32 %v1551_v2, %v1267_v54  ;;  %v1482_v5 = vpop.f32.mrb[35].mxu0  ;;  %v1553_v46 = vpop.f32.mrb[35].mxu1 }
 0x363   :  { %v1483_v18 = vadd.f32 %v1482_v5, %v1267_v54  ;;  %v1554_v10 = vadd.f32 %v1553_v46, %v1267_v54 }
 0x365   :  { %v1566_v21 = vcombine.low %v1481_v42, %v1483_v18  ;;  %v1567_v30 = vcombine.low %v1552_v4, %v1554_v10 }
 0x367   :  { %1574 = vst [vmem:[#allocation2 + $0x10] sm:$0x77] %v1566_v21  ;;  %1575 = vst [vmem:[#allocation2 + $0x18] sm:$0x77] %v1567_v30 }
 0x368   :  { %1743 = shalt.err (!%p1740_p4)
}
 0x369   :  { %s1744_s17 = scalar_lea.hbm %s2293_s9, 512 }
 0x36a   :  { %p1745_p5 = scmp.ne.s32.totalorder %s2293_s9, %s1744_s17  ;;  %p1748_p6 = scmp.lt.u32.totalorder %s1744_s17, %s2293_s9 }
 0x36c   :  { %p1750_p7 = pnand %p1748_p6, %p1745_p5 }
 0x36e   :  { %1753 = shalt.err (!%p1750_p7)
}
 0x36f   :  { %1585 = dma.vmem_to_hbm [thread:$0]  %s1583_s14, 512, %s2293_s9, [#allocation3]  }
 0x370   :  { %1754 = dma.done.wait [#allocation3], 512  }
 0x371   :  { %1755 = vsyncadd [#allocation3], 4294966784 }
 0x372   :  { %1589 = vsyncpa [#allocation3], 1 }

</bundles_post_ra>
